<compile_context>
chip_gen: v6e
topology: v6e:2x2x1
jax: 0.10.0
libtpu: 0.0.40
codegen_flags: <defaults>
</compile_context>

<pallas_src>
import functools

import jax
import jax.numpy as jnp
from jax.experimental import pallas as pl
from jax.experimental.pallas import tpu as pltpu


# ---------------------------------------------------------------------------
# Pallas kernel factory: per-scale masked gradient statistics
# ---------------------------------------------------------------------------
def _make_scale_kernel(n_pred, is_scale0, max_depth, t_valid):
    """Kernel over one (b*c, H-tile) block.

    Inputs (per grid step, each (tile_h, W)):
        is_scale0: gt_raw, pred_raw_0..n-1            (clamp + mask fused in-kernel)
        else:      gt_pooled, mask_pooled, pred_pooled_0..n-1
    Output (per b*c row, accumulated over H tiles): (8, 128) f32
        [0, 0]        = num_valid  (sum of mask_u + mask_v)
        [0, 1 + i]    = sum(mask_u*|d_u res_i|) + sum(mask_v*|d_v res_i|)
    Scratch:
        prev_m_ref   (1, W)          last mask row of the previous H tile
        prev_res_ref (n_pred, 1, W)  last residual row of the previous H tile per pred
    """

    def kernel(*args):
        idx = 0
        gt_ref = args[idx]; idx += 1
        mask_ref = None
        if not is_scale0:
            mask_ref = args[idx]; idx += 1
        pred_refs = args[idx:idx + n_pred]; idx += n_pred
        out_ref = args[idx]; idx += 1
        prev_m_ref = args[idx]; idx += 1
        prev_res_ref = args[idx]; idx += 1

        h = pl.program_id(1)

        # -- init accumulator + boundary carry at the first H tile of this (b, c) row --
        @pl.when(h == 0)
        def _init():
            out_ref[...] = jnp.zeros_like(out_ref)
            prev_m_ref[...] = jnp.zeros_like(prev_m_ref)
            prev_res_ref[...] = jnp.zeros_like(prev_res_ref)

        gt_t = gt_ref[...]                                   # (th, W)
        if is_scale0:
            # Fused clamp + validity mask (saves one full-size HBM read at scale 0;
            # the /mask normalisation is a no-op because mask is exactly {0, 1}).
            gt_n = jnp.clip(gt_t, 0.0, max_depth)
            m_n = (gt_n > t_valid).astype(jnp.float32)
        else:
            m_t = mask_ref[...]
            valid = m_t > 0.0
            gt_n = jnp.where(valid, gt_t / jnp.where(valid, m_t, 1.0), gt_t)
            m_n = jnp.where(valid, 1.0, m_t)

        th, _w = gt_n.shape
        prev_m = prev_m_ref[...]                             # (1, W); zeros at h == 0

        # horizontal (u) neighbour pairs — fully inside the tile
        mask_u = m_n[:, 1:] * m_n[:, :-1]                    # (th, W-1)
        # vertical (v) pairs inside the tile
        mask_v_in = m_n[1:, :] * m_n[:-1, :]                 # (th-1, W)
        # vertical pair across the tile boundary (row 0 vs carried previous row);
        # prev_m == 0 at h == 0, so the non-existent pair contributes nothing.
        m_first = m_n[0:1, :]
        mask_v_b = m_first * prev_m                          # (1, W)

        nv = jnp.sum(mask_u) + jnp.sum(mask_v_in) + jnp.sum(mask_v_b)

        lane = jax.lax.broadcasted_iota(jnp.int32, (8, 128), 1)
        sub = jax.lax.broadcasted_iota(jnp.int32, (8, 128), 0)
        row0 = sub == 0
        contrib = jnp.where(row0 & (lane == 0), nv, 0.0)

        # NOTE: nan_to_num removed — inputs are clamped / division is guarded, so the
        # masked products cannot produce NaN/Inf.
        for i in range(n_pred):
            p_t = pred_refs[i][...]
            if is_scale0:
                p_t = jnp.clip(p_t, 0.0, max_depth)
            res = p_t - gt_n                                 # (th, W)
            s_u = jnp.sum(mask_u * jnp.abs(res[:, 1:] - res[:, :-1]))
            s_v = jnp.sum(mask_v_in * jnp.abs(res[1:, :] - res[:-1, :]))
            s_b = jnp.sum(mask_v_b * jnp.abs(res[0:1, :] - prev_res_ref[i]))
            s_i = s_u + s_v + s_b
            contrib = contrib + jnp.where(row0 & (lane == i + 1), s_i, 0.0)
            # carry this tile's last residual row for the next tile's boundary pair
            prev_res_ref[i] = res[th - 1:th, :]

        prev_m_ref[...] = m_n[th - 1:th, :]
        out_ref[...] = out_ref[...] + contrib

    return kernel


# ---------------------------------------------------------------------------
# Tiling helpers
# ---------------------------------------------------------------------------
def _pick_tile_h(hs, target=128):
    """Largest multiple of 8 <= target that divides hs (fallback: full height)."""
    if hs % 8 != 0 or hs <= target:
        return hs
    th = (target // 8) * 8
    while hs % th != 0:
        th -= 8
    return th


def _resolve_tile_h(hs, tile_h):
    if (tile_h is not None and tile_h >= 2 and hs % tile_h == 0
            and (tile_h % 8 == 0 or tile_h == hs)):
        return tile_h
    return _pick_tile_h(hs)


def _use_pallas(hs, ws, scale):
    # Always run the dominant full-resolution scale in Pallas; for coarse scales only
    # when the layout is lane-dense (avoids paying launch + masked-lane overhead for
    # negligible work — see perf review item on lane layout at coarse scales).
    if hs < 2 or ws < 2:
        return False
    return scale == 0 or (ws >= 128 and hs >= 8)


# ---------------------------------------------------------------------------
# Pallas-backed per-scale loss
# ---------------------------------------------------------------------------
def _pallas_scale_loss(gt, mask, preds, weights, *, is_scale0, max_depth, t_valid,
                       tile_h=None):
    n_pred = len(preds)
    assert n_pred <= 127, "n_pred must fit in the 128-lane stats row"
    B, C, H, W = gt.shape
    N = B * C
    th = _resolve_tile_h(H, tile_h)
    n_h = H // th

    inputs = [gt.reshape(N, H, W)]
    if not is_scale0:
        inputs.append(mask.reshape(N, H, W))
    inputs += [p.reshape(N, H, W) for p in preds]

    kernel = _make_scale_kernel(n_pred, is_scale0, max_depth, t_valid)

    in_specs = [pl.BlockSpec((None, th, W), lambda n, h: (n, h, 0)) for _ in inputs]
    out_spec = pl.BlockSpec((None, 8, 128), lambda n, h: (n, 0, 0))

    stats = pl.pallas_call(
        kernel,
        out_shape=jax.ShapeDtypeStruct((N, 8, 128), jnp.float32),
        grid_spec=pltpu.PrefetchScalarGridSpec(
            num_scalar_prefetch=0,
            grid=(N, n_h),                       # (parallel batch*channel, H tiles)
            in_specs=in_specs,
            out_specs=out_spec,
            scratch_shapes=[
                pltpu.VMEM((1, W), jnp.float32),           # prev mask row
                pltpu.VMEM((n_pred, 1, W), jnp.float32),   # prev residual rows
            ]),
        compiler_params=pltpu.CompilerParams(
            dimension_semantics=("parallel", "arbitrary"),  # megacore over B*C on v7x
            vmem_limit_bytes=32 * 1024 * 1024),
    )(*inputs)

    # tiny finalisation in JAX: sum over channels, normalise per batch, weight per pred
    per_bc = stats[:, 0, :].reshape(B, C, 128)
    per_b = jnp.sum(per_bc, axis=1)                          # (B, 128)
    num_valid = per_b[:, 0]
    inv = 1.0 / (num_valid + 1e-8)
    loss = jnp.float32(0.0)
    for i in range(n_pred):
        loss = loss + jnp.float32(weights[i]) * jnp.sum(per_b[:, 1 + i] * inv)
    return loss


# ---------------------------------------------------------------------------
# Plain-JAX fallback for tiny (non-lane-dense) pyramid levels
# ---------------------------------------------------------------------------
def _scale_loss_jax(gt_s, m_s, preds_s, weights):
    valid = m_s > 0.0
    gt_n = jnp.where(valid, gt_s / jnp.where(valid, m_s, 1.0), gt_s)
    m_n = jnp.where(valid, 1.0, m_s)
    mu = m_n[:, :, :, 1:] * m_n[:, :, :, :-1]
    mv = m_n[:, :, 1:, :] * m_n[:, :, :-1, :]
    nv = mu.sum(axis=(1, 2, 3)) + mv.sum(axis=(1, 2, 3))
    inv = 1.0 / (nv + 1e-8)
    loss = jnp.float32(0.0)
    for i, p in enumerate(preds_s):
        r = p - gt_n
        gu = jnp.abs(r[:, :, :, 1:] - r[:, :, :, :-1])
        gv = jnp.abs(r[:, :, 1:, :] - r[:, :, :-1, :])
        s = (mu * gu).sum(axis=(1, 2, 3)) + (mv * gv).sum(axis=(1, 2, 3))
        loss = loss + jnp.float32(weights[i]) * jnp.sum(s * inv)
    return loss


# ---------------------------------------------------------------------------
# JAX glue: replicate pad + avg_pool2d(2^s)  (exact reshape-mean)
# ---------------------------------------------------------------------------
def _rep_pad_avg_pool(x, f):
    if f == 1:
        return x
    b, c, h, w = x.shape
    ph = (-h) % f
    pw = (-w) % f
    x = jnp.pad(x, ((0, 0), (0, 0), (0, ph), (0, pw)), mode="edge")
    hs, ws = (h + ph) // f, (w + pw) // f
    return x.reshape(b, c, hs, f, ws, f).mean(axis=(3, 5))


# ---------------------------------------------------------------------------
# Forward (mirrors GradMatchingScaleLoss.forward)
# ---------------------------------------------------------------------------
def grad_matching_scale_loss(seq_pred, gt, *, max_depth, gamma, scale_level,
                             t_valid=1e-4, tile_h=None):
    gt = gt.astype(jnp.float32)
    seq_pred = [p.astype(jnp.float32) for p in seq_pred]
    n_pred = len(seq_pred)
    weights = [gamma ** (n_pred - 1 - i) for i in range(n_pred)]
    _, _, H, W = gt.shape

    total = jnp.float32(0.0)

    # ---- scale 0: fused clamp + mask inside the tiled Pallas kernel ----
    if _use_pallas(H, W, scale=0):
        total = total + _pallas_scale_loss(
            gt, None, seq_pred, weights, is_scale0=True,
            max_depth=max_depth, t_valid=t_valid, tile_h=tile_h)
    else:
        gt_c0 = jnp.clip(gt, 0.0, max_depth)
        preds_c0 = [jnp.clip(p, 0.0, max_depth) for p in seq_pred]
        m0 = (gt_c0 > t_valid).astype(jnp.float32)
        total = total + _scale_loss_jax(gt_c0, m0, preds_c0, weights)

    # ---- coarser scales: XLA builds the pooled pyramid, kernel or JAX evaluates it ----
    if scale_level > 1:
        gt_c = jnp.clip(gt, 0.0, max_depth)
        preds_c = [jnp.clip(p, 0.0, max_depth) for p in seq_pred]
        mask = (gt_c > t_valid).astype(jnp.float32)
        for scale in range(1, scale_level):
            f = 2 ** scale
            gt_s = _rep_pad_avg_pool(gt_c, f)
            m_s = _rep_pad_avg_pool(mask, f)
            preds_s = [_rep_pad_avg_pool(p, f) for p in preds_c]
            Hs, Ws = gt_s.shape[-2], gt_s.shape[-1]
            if _use_pallas(Hs, Ws, scale):
                total = total + _pallas_scale_loss(
                    gt_s, m_s, preds_s, weights, is_scale0=False,
                    max_depth=max_depth, t_valid=t_valid, tile_h=None)
            else:
                total = total + _scale_loss_jax(gt_s, m_s, preds_s, weights)
    return total


# ---------------------------------------------------------------------------
# Pure-JAX reference (direct transcription of the PyTorch module) for checking
# ---------------------------------------------------------------------------
def _reference_loss(seq_pred, gt, *, max_depth, gamma, scale_level, t_valid=1e-4):
    gt = jnp.clip(gt, 0.0, max_depth)
    seq_pred = [jnp.clip(p, 0.0, max_depth) for p in seq_pred]
    n = len(seq_pred)
    mask = (gt > t_valid).astype(jnp.float32)
    loss = jnp.float32(0.0)
    for scale in range(scale_level):
        f = 2 ** scale
        gt_s = _rep_pad_avg_pool(gt, f)
        m_s = _rep_pad_avg_pool(mask, f)
        valid = m_s > 0.0
        gt_s = jnp.where(valid, gt_s / jnp.where(valid, m_s, 1.0), gt_s)
        m_s = jnp.where(valid, 1.0, m_s)
        mu = m_s[:, :, :, 1:] * m_s[:, :, :, :-1]
        mv = m_s[:, :, 1:, :] * m_s[:, :, :-1, :]
        nv = mu.sum(axis=(1, 2, 3)) + mv.sum(axis=(1, 2, 3))
        for i in range(n):
            p_s = _rep_pad_avg_pool(seq_pred[i], f)
            w = gamma ** (n - 1 - i)
            r = p_s - gt_s
            gu = jnp.abs(r[:, :, :, 1:] - r[:, :, :, :-1])
            gv = jnp.abs(r[:, :, 1:, :] - r[:, :, :-1, :])
            lu = jnp.nan_to_num(mu * gu).sum(axis=(1, 2, 3)) / (nv + 1e-8)
            lv = jnp.nan_to_num(mv * gv).sum(axis=(1, 2, 3)) / (nv + 1e-8)
            loss = loss + w * jnp.sum(lu + lv)
    return loss


if __name__ == "__main__":
    # args: max_depth=10.0, sequence_loss_decay=0.8, scale_level=3
    MAX_DEPTH = 10.0
    GAMMA = 0.8
    SCALE_LEVEL = 3
    N_PRED = 2

    # Small but lane-dense shapes: W=128 keeps the full-res scale on the 128-lane axis;
    # H=16 with tile_h=8 exercises the H-tiling + boundary-row carry (2 tiles per image).
    B, C, H, W = 2, 1, 16, 128

    key = jax.random.PRNGKey(0)
    k_gt, k_inv, k_pred = jax.random.split(key, 3)

    gt = jax.random.uniform(k_gt, (B, C, H, W), jnp.float32, 0.0, MAX_DEPTH)
    invalid = jax.random.uniform(k_inv, (B, C, H, W)) < 0.3
    gt = jnp.where(invalid, 0.0, gt)            # some invalid (zero-depth) pixels

    pred_keys = jax.random.split(k_pred, N_PRED)
    seq_pred = [jax.random.uniform(k, (B, C, H, W), jnp.float32, 0.0, MAX_DEPTH)
                for k in pred_keys]

    loss_fn = jax.jit(functools.partial(
        grad_matching_scale_loss, max_depth=MAX_DEPTH, gamma=GAMMA,
        scale_level=SCALE_LEVEL, tile_h=8))

    loss = jax.block_until_ready(loss_fn(seq_pred, gt))

    ref = jax.block_until_ready(_reference_loss(
        seq_pred, gt, max_depth=MAX_DEPTH, gamma=GAMMA, scale_level=SCALE_LEVEL))

    assert jnp.isfinite(loss), "non-finite loss"
    assert jnp.allclose(loss, ref, rtol=1e-4, atol=1e-4), (loss, ref)

    print("KERNEL_OK")
</pallas_src>

<mosaic_0001>
module attributes {stable_mosaic.version = 11 : i64} {
  func.func @kernel(%arg0: i32, %arg1: i32, %arg2: memref<1x8x128xf32, #tpu.memory_space<vmem>>, %arg3: memref<1x8x128xf32, #tpu.memory_space<vmem>>, %arg4: memref<1x8x128xf32, #tpu.memory_space<vmem>>, %arg5: memref<1x8x128xf32, #tpu.memory_space<vmem>>, %arg6: memref<1x128xf32, #tpu.memory_space<vmem>>, %arg7: memref<2x1x128xf32, #tpu.memory_space<vmem>>) attributes {dimension_semantics = [#tpu.dimension_semantics<parallel>, #tpu.dimension_semantics<arbitrary>], iteration_bounds = array<i64: 2, 2>, scalar_prefetch = 0 : i64, scratch_operands = 2 : i64, tpu.core_type = #tpu.core_type<tc>, window_params = [{transform_indices = @transform_0, window_bounds = array<i64: 1, 8, 128>}, {transform_indices = @transform_1, window_bounds = array<i64: 1, 8, 128>}, {transform_indices = @transform_2, window_bounds = array<i64: 1, 8, 128>}, {transform_indices = @transform_3, window_bounds = array<i64: 1, 8, 128>}]} {
    %c0_i32 = arith.constant 0 : i32
    %0 = arith.cmpi eq, %arg1, %c0_i32 : i32
    %1 = arith.extui %0 : i1 to i32
    %c0_i32_0 = arith.constant 0 : i32
    %2 = arith.cmpi ne, %1, %c0_i32_0 : i32
    scf.if %2 {
      %cst_50 = arith.constant 0.000000e+00 : f32
      %150 = vector.broadcast %cst_50 : f32 to vector<8x128xf32>
      %c0_51 = arith.constant 0 : index
      %c0_52 = arith.constant 0 : index
      %c0_53 = arith.constant 0 : index
      %151 = vector.load %arg5[%c0_51, %c0_52, %c0_53] : memref<1x8x128xf32, #tpu.memory_space<vmem>>, vector<1x8x128xf32>
      %152 = vector.shape_cast %151 : vector<1x8x128xf32> to vector<8x128xf32>
      %153 = vector.shape_cast %150 : vector<8x128xf32> to vector<1x8x128xf32>
      tpu.vector_store %arg5[%c0_51, %c0_52, %c0_53], %153 {strides = array<i32>} : memref<1x8x128xf32, #tpu.memory_space<vmem>>, vector<1x8x128xf32>,
      %cst_54 = arith.constant 0.000000e+00 : f32
      %154 = vector.broadcast %cst_54 : f32 to vector<1x128xf32>
      %c0_55 = arith.constant 0 : index
      %c0_56 = arith.constant 0 : index
      %155 = vector.load %arg6[%c0_55, %c0_56] : memref<1x128xf32, #tpu.memory_space<vmem>>, vector<1x128xf32>
      tpu.vector_store %arg6[%c0_55, %c0_56], %154 {strides = array<i32>} : memref<1x128xf32, #tpu.memory_space<vmem>>, vector<1x128xf32>,
      %cst_57 = arith.constant 0.000000e+00 : f32
      %156 = vector.broadcast %cst_57 : f32 to vector<2x1x128xf32>
      %c0_58 = arith.constant 0 : index
      %c0_59 = arith.constant 0 : index
      %c0_60 = arith.constant 0 : index
      %157 = vector.load %arg7[%c0_58, %c0_59, %c0_60] : memref<2x1x128xf32, #tpu.memory_space<vmem>>, vector<2x1x128xf32>
      tpu.vector_store %arg7[%c0_58, %c0_59, %c0_60], %156 {strides = array<i32>} : memref<2x1x128xf32, #tpu.memory_space<vmem>>, vector<2x1x128xf32>,
    } else {
    }
    %c0 = arith.constant 0 : index
    %c0_1 = arith.constant 0 : index
    %c0_2 = arith.constant 0 : index
    %3 = vector.load %arg2[%c0, %c0_1, %c0_2] : memref<1x8x128xf32, #tpu.memory_space<vmem>>, vector<1x8x128xf32>
    %4 = vector.shape_cast %3 : vector<1x8x128xf32> to vector<8x128xf32>
    %cst = arith.constant 0.000000e+00 : f32
    %cst_3 = arith.constant 1.000000e+01 : f32
    %5 = vector.broadcast %cst : f32 to vector<8x128xf32>
    %6 = arith.maximumf %5, %4 : vector<8x128xf32>
    %7 = vector.broadcast %cst_3 : f32 to vector<8x128xf32>
    %8 = arith.minimumf %7, %6 : vector<8x128xf32>
    %cst_4 = arith.constant 9.99999974E-5 : f32
    %9 = vector.broadcast %cst_4 : f32 to vector<8x128xf32>
    %10 = arith.cmpf ogt, %8, %9 : vector<8x128xf32>
    %11 = arith.extui %10 : vector<8x128xi1> to vector<8x128xi32>
    %12 = arith.sitofp %11 : vector<8x128xi32> to vector<8x128xf32>
    %c0_5 = arith.constant 0 : index
    %c0_6 = arith.constant 0 : index
    %13 = vector.load %arg6[%c0_5, %c0_6] : memref<1x128xf32, #tpu.memory_space<vmem>>, vector<1x128xf32>
    %14 = vector.extract_strided_slice %12 {offsets = [0, 1], sizes = [8, 127], strides = [1, 1]} : vector<8x128xf32> to vector<8x127xf32>
    %15 = vector.extract_strided_slice %12 {offsets = [0, 0], sizes = [8, 127], strides = [1, 1]} : vector<8x128xf32> to vector<8x127xf32>
    %16 = arith.mulf %14, %15 : vector<8x127xf32>
    %17 = vector.extract_strided_slice %12 {offsets = [1, 0], sizes = [7, 128], strides = [1, 1]} : vector<8x128xf32> to vector<7x128xf32>
    %18 = vector.extract_strided_slice %12 {offsets = [0, 0], sizes = [7, 128], strides = [1, 1]} : vector<8x128xf32> to vector<7x128xf32>
    %19 = arith.mulf %17, %18 : vector<7x128xf32>
    %20 = vector.extract_strided_slice %12 {offsets = [0, 0], sizes = [1, 128], strides = [1, 1]} : vector<8x128xf32> to vector<1x128xf32>
    %21 = arith.mulf %20, %13 : vector<1x128xf32>
    %22 = vector.shape_cast %16 : vector<8x127xf32> to vector<1x8x127xf32>
    %cst_7 = arith.constant dense<0.000000e+00> : vector<1xf32>
    %23 = vector.multi_reduction <add>, %22, %cst_7 [1, 2] : vector<1x8x127xf32> to vector<1xf32>
    %24 = vector.shape_cast %23 : vector<1xf32> to vector<1x1x1xf32>
    %25 = vector.extract %24[0, 0, 0] : f32 from vector<1x1x1xf32>
    %26 = vector.shape_cast %19 : vector<7x128xf32> to vector<1x7x128xf32>
    %cst_8 = arith.constant dense<0.000000e+00> : vector<1xf32>
    %27 = vector.multi_reduction <add>, %26, %cst_8 [1, 2] : vector<1x7x128xf32> to vector<1xf32>
    %28 = vector.shape_cast %27 : vector<1xf32> to vector<1x1x1xf32>
    %29 = vector.extract %28[0, 0, 0] : f32 from vector<1x1x1xf32>
    %30 = arith.addf %25, %29 : f32
    %31 = vector.shape_cast %21 : vector<1x128xf32> to vector<1x1x128xf32>
    %cst_9 = arith.constant dense<0.000000e+00> : vector<1xf32>
    %32 = vector.multi_reduction <add>, %31, %cst_9 [1, 2] : vector<1x1x128xf32> to vector<1xf32>
    %33 = vector.shape_cast %32 : vector<1xf32> to vector<1x1x1xf32>
    %34 = vector.extract %33[0, 0, 0] : f32 from vector<1x1x1xf32>
    %35 = arith.addf %30, %34 : f32
    %36 = tpu.iota {dimensions = array<i32: 1>} : vector<8x128xi32>
    %37 = tpu.iota {dimensions = array<i32: 0>} : vector<8x128xi32>
    %c0_i32_10 = arith.constant 0 : i32
    %38 = vector.broadcast %c0_i32_10 : i32 to vector<8x128xi32>
    %39 = arith.cmpi eq, %37, %38 : vector<8x128xi32>
    %c0_i32_11 = arith.constant 0 : i32
    %40 = vector.broadcast %c0_i32_11 : i32 to vector<8x128xi32>
    %41 = arith.cmpi eq, %36, %40 : vector<8x128xi32>
    %42 = arith.andi %39, %41 : vector<8x128xi1>
    %cst_12 = arith.constant 0.000000e+00 : f32
    %43 = vector.broadcast %35 : f32 to vector<8x128xf32>
    %44 = vector.broadcast %cst_12 : f32 to vector<8x128xf32>
    %45 = arith.select %42, %43, %44 : vector<8x128xi1>, vector<8x128xf32>
    %c0_13 = arith.constant 0 : index
    %c0_14 = arith.constant 0 : index
    %c0_15 = arith.constant 0 : index
    %46 = vector.load %arg3[%c0_13, %c0_14, %c0_15] : memref<1x8x128xf32, #tpu.memory_space<vmem>>, vector<1x8x128xf32>
    %47 = vector.shape_cast %46 : vector<1x8x128xf32> to vector<8x128xf32>
    %cst_16 = arith.constant 0.000000e+00 : f32
    %cst_17 = arith.constant 1.000000e+01 : f32
    %48 = vector.broadcast %cst_16 : f32 to vector<8x128xf32>
    %49 = arith.maximumf %48, %47 : vector<8x128xf32>
    %50 = vector.broadcast %cst_17 : f32 to vector<8x128xf32>
    %51 = arith.minimumf %50, %49 : vector<8x128xf32>
    %52 = arith.subf %51, %8 : vector<8x128xf32>
    %53 = vector.extract_strided_slice %52 {offsets = [0, 1], sizes = [8, 127], strides = [1, 1]} : vector<8x128xf32> to vector<8x127xf32>
    %54 = vector.extract_strided_slice %52 {offsets = [0, 0], sizes = [8, 127], strides = [1, 1]} : vector<8x128xf32> to vector<8x127xf32>
    %55 = arith.subf %53, %54 : vector<8x127xf32>
    %56 = math.absf %55 : vector<8x127xf32>
    %57 = arith.mulf %16, %56 : vector<8x127xf32>
    %58 = vector.shape_cast %57 : vector<8x127xf32> to vector<1x8x127xf32>
    %cst_18 = arith.constant dense<0.000000e+00> : vector<1xf32>
    %59 = vector.multi_reduction <add>, %58, %cst_18 [1, 2] : vector<1x8x127xf32> to vector<1xf32>
    %60 = vector.shape_cast %59 : vector<1xf32> to vector<1x1x1xf32>
    %61 = vector.extract %60[0, 0, 0] : f32 from vector<1x1x1xf32>
    %62 = vector.extract_strided_slice %52 {offsets = [1, 0], sizes = [7, 128], strides = [1, 1]} : vector<8x128xf32> to vector<7x128xf32>
    %63 = vector.extract_strided_slice %52 {offsets = [0, 0], sizes = [7, 128], strides = [1, 1]} : vector<8x128xf32> to vector<7x128xf32>
    %64 = arith.subf %62, %63 : vector<7x128xf32>
    %65 = math.absf %64 : vector<7x128xf32>
    %66 = arith.mulf %19, %65 : vector<7x128xf32>
    %67 = vector.shape_cast %66 : vector<7x128xf32> to vector<1x7x128xf32>
    %cst_19 = arith.constant dense<0.000000e+00> : vector<1xf32>
    %68 = vector.multi_reduction <add>, %67, %cst_19 [1, 2] : vector<1x7x128xf32> to vector<1xf32>
    %69 = vector.shape_cast %68 : vector<1xf32> to vector<1x1x1xf32>
    %70 = vector.extract %69[0, 0, 0] : f32 from vector<1x1x1xf32>
    %71 = vector.extract_strided_slice %52 {offsets = [0, 0], sizes = [1, 128], strides = [1, 1]} : vector<8x128xf32> to vector<1x128xf32>
    %c0_20 = arith.constant 0 : index
    %c0_21 = arith.constant 0 : index
    %c0_22 = arith.constant 0 : index
    %72 = vector.load %arg7[%c0_20, %c0_21, %c0_22] : memref<2x1x128xf32, #tpu.memory_space<vmem>>, vector<1x1x128xf32>
    %73 = vector.shape_cast %72 : vector<1x1x128xf32> to vector<1x128xf32>
    %74 = arith.subf %71, %73 : vector<1x128xf32>
    %75 = math.absf %74 : vector<1x128xf32>
    %76 = arith.mulf %21, %75 : vector<1x128xf32>
    %77 = vector.shape_cast %76 : vector<1x128xf32> to vector<1x1x128xf32>
    %cst_23 = arith.constant dense<0.000000e+00> : vector<1xf32>
    %78 = vector.multi_reduction <add>, %77, %cst_23 [1, 2] : vector<1x1x128xf32> to vector<1xf32>
    %79 = vector.shape_cast %78 : vector<1xf32> to vector<1x1x1xf32>
    %80 = vector.extract %79[0, 0, 0] : f32 from vector<1x1x1xf32>
    %81 = arith.addf %61, %70 : f32
    %82 = arith.addf %81, %80 : f32
    %c1_i32 = arith.constant 1 : i32
    %83 = vector.broadcast %c1_i32 : i32 to vector<8x128xi32>
    %84 = arith.cmpi eq, %36, %83 : vector<8x128xi32>
    %85 = arith.andi %39, %84 : vector<8x128xi1>
    %cst_24 = arith.constant 0.000000e+00 : f32
    %86 = vector.broadcast %82 : f32 to vector<8x128xf32>
    %87 = vector.broadcast %cst_24 : f32 to vector<8x128xf32>
    %88 = arith.select %85, %86, %87 : vector<8x128xi1>, vector<8x128xf32>
    %89 = arith.addf %45, %88 : vector<8x128xf32>
    %90 = vector.extract_strided_slice %52 {offsets = [7, 0], sizes = [1, 128], strides = [1, 1]} : vector<8x128xf32> to vector<1x128xf32>
    %c0_25 = arith.constant 0 : index
    %c0_26 = arith.constant 0 : index
    %c0_27 = arith.constant 0 : index
    %91 = vector.load %arg7[%c0_25, %c0_26, %c0_27] : memref<2x1x128xf32, #tpu.memory_space<vmem>>, vector<1x1x128xf32>
    %92 = vector.shape_cast %91 : vector<1x1x128xf32> to vector<1x128xf32>
    %93 = vector.shape_cast %90 : vector<1x128xf32> to vector<1x1x128xf32>
    tpu.vector_store %arg7[%c0_25, %c0_26, %c0_27], %93 {strides = array<i32>} : memref<2x1x128xf32, #tpu.memory_space<vmem>>, vector<1x1x128xf32>,
    %c0_28 = arith.constant 0 : index
    %c0_29 = arith.constant 0 : index
    %c0_30 = arith.constant 0 : index
    %94 = vector.load %arg4[%c0_28, %c0_29, %c0_30] : memref<1x8x128xf32, #tpu.memory_space<vmem>>, vector<1x8x128xf32>
    %95 = vector.shape_cast %94 : vector<1x8x128xf32> to vector<8x128xf32>
    %cst_31 = arith.constant 0.000000e+00 : f32
    %cst_32 = arith.constant 1.000000e+01 : f32
    %96 = vector.broadcast %cst_31 : f32 to vector<8x128xf32>
    %97 = arith.maximumf %96, %95 : vector<8x128xf32>
    %98 = vector.broadcast %cst_32 : f32 to vector<8x128xf32>
    %99 = arith.minimumf %98, %97 : vector<8x128xf32>
    %100 = arith.subf %99, %8 : vector<8x128xf32>
    %101 = vector.extract_strided_slice %100 {offsets = [0, 1], sizes = [8, 127], strides = [1, 1]} : vector<8x128xf32> to vector<8x127xf32>
    %102 = vector.extract_strided_slice %100 {offsets = [0, 0], sizes = [8, 127], strides = [1, 1]} : vector<8x128xf32> to vector<8x127xf32>
    %103 = arith.subf %101, %102 : vector<8x127xf32>
    %104 = math.absf %103 : vector<8x127xf32>
    %105 = arith.mulf %16, %104 : vector<8x127xf32>
    %106 = vector.shape_cast %105 : vector<8x127xf32> to vector<1x8x127xf32>
    %cst_33 = arith.constant dense<0.000000e+00> : vector<1xf32>
    %107 = vector.multi_reduction <add>, %106, %cst_33 [1, 2] : vector<1x8x127xf32> to vector<1xf32>
    %108 = vector.shape_cast %107 : vector<1xf32> to vector<1x1x1xf32>
    %109 = vector.extract %108[0, 0, 0] : f32 from vector<1x1x1xf32>
    %110 = vector.extract_strided_slice %100 {offsets = [1, 0], sizes = [7, 128], strides = [1, 1]} : vector<8x128xf32> to vector<7x128xf32>
    %111 = vector.extract_strided_slice %100 {offsets = [0, 0], sizes = [7, 128], strides = [1, 1]} : vector<8x128xf32> to vector<7x128xf32>
    %112 = arith.subf %110, %111 : vector<7x128xf32>
    %113 = math.absf %112 : vector<7x128xf32>
    %114 = arith.mulf %19, %113 : vector<7x128xf32>
    %115 = vector.shape_cast %114 : vector<7x128xf32> to vector<1x7x128xf32>
    %cst_34 = arith.constant dense<0.000000e+00> : vector<1xf32>
    %116 = vector.multi_reduction <add>, %115, %cst_34 [1, 2] : vector<1x7x128xf32> to vector<1xf32>
    %117 = vector.shape_cast %116 : vector<1xf32> to vector<1x1x1xf32>
    %118 = vector.extract %117[0, 0, 0] : f32 from vector<1x1x1xf32>
    %119 = vector.extract_strided_slice %100 {offsets = [0, 0], sizes = [1, 128], strides = [1, 1]} : vector<8x128xf32> to vector<1x128xf32>
    %c1 = arith.constant 1 : index
    %c0_35 = arith.constant 0 : index
    %c0_36 = arith.constant 0 : index
    %120 = vector.load %arg7[%c1, %c0_35, %c0_36] : memref<2x1x128xf32, #tpu.memory_space<vmem>>, vector<1x1x128xf32>
    %121 = vector.shape_cast %120 : vector<1x1x128xf32> to vector<1x128xf32>
    %122 = arith.subf %119, %121 : vector<1x128xf32>
    %123 = math.absf %122 : vector<1x128xf32>
    %124 = arith.mulf %21, %123 : vector<1x128xf32>
    %125 = vector.shape_cast %124 : vector<1x128xf32> to vector<1x1x128xf32>
    %cst_37 = arith.constant dense<0.000000e+00> : vector<1xf32>
    %126 = vector.multi_reduction <add>, %125, %cst_37 [1, 2] : vector<1x1x128xf32> to vector<1xf32>
    %127 = vector.shape_cast %126 : vector<1xf32> to vector<1x1x1xf32>
    %128 = vector.extract %127[0, 0, 0] : f32 from vector<1x1x1xf32>
    %129 = arith.addf %109, %118 : f32
    %130 = arith.addf %129, %128 : f32
    %c2_i32 = arith.constant 2 : i32
    %131 = vector.broadcast %c2_i32 : i32 to vector<8x128xi32>
    %132 = arith.cmpi eq, %36, %131 : vector<8x128xi32>
    %133 = arith.andi %39, %132 : vector<8x128xi1>
    %cst_38 = arith.constant 0.000000e+00 : f32
    %134 = vector.broadcast %130 : f32 to vector<8x128xf32>
    %135 = vector.broadcast %cst_38 : f32 to vector<8x128xf32>
    %136 = arith.select %133, %134, %135 : vector<8x128xi1>, vector<8x128xf32>
    %137 = arith.addf %89, %136 : vector<8x128xf32>
    %138 = vector.extract_strided_slice %100 {offsets = [7, 0], sizes = [1, 128], strides = [1, 1]} : vector<8x128xf32> to vector<1x128xf32>
    %c1_39 = arith.constant 1 : index
    %c0_40 = arith.constant 0 : index
    %c0_41 = arith.constant 0 : index
    %139 = vector.load %arg7[%c1_39, %c0_40, %c0_41] : memref<2x1x128xf32, #tpu.memory_space<vmem>>, vector<1x1x128xf32>
    %140 = vector.shape_cast %139 : vector<1x1x128xf32> to vector<1x128xf32>
    %141 = vector.shape_cast %138 : vector<1x128xf32> to vector<1x1x128xf32>
    tpu.vector_store %arg7[%c1_39, %c0_40, %c0_41], %141 {strides = array<i32>} : memref<2x1x128xf32, #tpu.memory_space<vmem>>, vector<1x1x128xf32>,
    %142 = vector.extract_strided_slice %12 {offsets = [7, 0], sizes = [1, 128], strides = [1, 1]} : vector<8x128xf32> to vector<1x128xf32>
    %c0_42 = arith.constant 0 : index
    %c0_43 = arith.constant 0 : index
    %143 = vector.load %arg6[%c0_42, %c0_43] : memref<1x128xf32, #tpu.memory_space<vmem>>, vector<1x128xf32>
    tpu.vector_store %arg6[%c0_42, %c0_43], %142 {strides = array<i32>} : memref<1x128xf32, #tpu.memory_space<vmem>>, vector<1x128xf32>,
    %c0_44 = arith.constant 0 : index
    %c0_45 = arith.constant 0 : index
    %c0_46 = arith.constant 0 : index
    %144 = vector.load %arg5[%c0_44, %c0_45, %c0_46] : memref<1x8x128xf32, #tpu.memory_space<vmem>>, vector<1x8x128xf32>
    %145 = vector.shape_cast %144 : vector<1x8x128xf32> to vector<8x128xf32>
    %146 = arith.addf %145, %137 : vector<8x128xf32>
    %c0_47 = arith.constant 0 : index
    %c0_48 = arith.constant 0 : index
    %c0_49 = arith.constant 0 : index
    %147 = vector.load %arg5[%c0_47, %c0_48, %c0_49] : memref<1x8x128xf32, #tpu.memory_space<vmem>>, vector<1x8x128xf32>
    %148 = vector.shape_cast %147 : vector<1x8x128xf32> to vector<8x128xf32>
    %149 = vector.shape_cast %146 : vector<8x128xf32> to vector<1x8x128xf32>
    tpu.vector_store %arg5[%c0_47, %c0_48, %c0_49], %149 {strides = array<i32>} : memref<1x8x128xf32, #tpu.memory_space<vmem>>, vector<1x8x128xf32>,
    return
  }
  func.func @transform_0(%arg0: i32, %arg1: i32) -> (i32, i32, i32) {
    %c0_i32 = arith.constant 0 : i32
    %c0_i32_0 = arith.constant 0 : i32
    return %arg0, %arg1, %c0_i32 : i32, i32, i32
  }
  func.func @transform_1(%arg0: i32, %arg1: i32) -> (i32, i32, i32) {
    %c0_i32 = arith.constant 0 : i32
    %c0_i32_0 = arith.constant 0 : i32
    return %arg0, %arg1, %c0_i32 : i32, i32, i32
  }
  func.func @transform_2(%arg0: i32, %arg1: i32) -> (i32, i32, i32) {
    %c0_i32 = arith.constant 0 : i32
    %c0_i32_0 = arith.constant 0 : i32
    return %arg0, %arg1, %c0_i32 : i32, i32, i32
  }
  func.func @transform_3(%arg0: i32, %arg1: i32) -> (i32, i32, i32) {
    %c0_i32 = arith.constant 0 : i32
    %c0_i32_0 = arith.constant 0 : i32
    %c0_i32_1 = arith.constant 0 : i32
    return %arg0, %c0_i32, %c0_i32_0 : i32, i32, i32
  }
}

</mosaic_0001>

<bundles_post_ra>
// kernel: grad_matching_scale_loss.1
= control target key start
LH: loop header
LB: loop body
LE: loop exit
PB: predicated region body
PF: predicated region fallthrough
CT: control target
= control target key end

     0   :  { %s712_s12 = smov 0   ;;  %s714_s13 = smov 0   ;;  %s783_s0 = inlined_call_operand.vmem [shape: f32[2,16,128], index: 0, kind: input, shape index: {}]   ;;  %s784_s1 = inlined_call_operand.vmem [shape: f32[2,16,128], index: 1, kind: input, shape index: {}]   ;;  %s785_s2 = inlined_call_operand.vmem [shape: f32[2,16,128], index: 2, kind: input, shape index: {}]   ;;  %s786_s3 = inlined_call_operand.vmem [shape: f32[2,8,128], index: 3, kind: output, shape index: {}]  }
   0x1   :  { %s716_s14 = smov 0   ;;  %s718_s15 = smov 0  }
   0x2   :  { %s720_s16 = smov 0  }
   0x3 LB: > { %s22_s17 = sadd.s32 1, %s678_s14  ;;  %s25_s18 = sadd.s32 1, %s682_s15  ;;  %s686_s16 = sphi %s720_s16, %s13_s16   ;;  %s682_s15 = sphi %s718_s15, %s790_s15   ;;  %s678_s14 = sphi %s716_s14, %s789_s14   ;;  %s674_s13 = sphi %s714_s13, %s788_s13   ;;  %s670_s12 = sphi %s712_s12, %s787_s12  }
   0x4   : > { %p23_p0 = scmp.ge.s32.totalorder %s22_s17, 2  ;;  %p574_p1 = scmp.ge.s32.totalorder %s686_s16, 1 }
   0x5   : > { %p184_p2 = scmp.lt.s32.totalorder %s686_s16, 5 }
   0x6   : > { %s792_s17 = smov (%p23_p0, %s22_s17), 0  ;;  %s794_s18 = smov (!%p23_p0, %s25_s18), %s682_s15 }
   0x7   : > { %p185_p3 = pnand %p574_p1, %p184_p2  ;;  %p27_p4 = scmp.ge.s32.totalorder %s794_s18, 2 }
   0x8   : > { %p226_p5 = scmp.lt.s32.totalorder (!%p185_p3), %s674_s13, 1  ;;  %p228_p6 = scmp.lt.s32.totalorder (!%p185_p3), %s670_s12, 1 }
   0x9   : > { %s796_s18 = smov (%p27_p4, %s794_s18), 0  ;;  %188 = sbr.rel (%p185_p3) target bundleno = 490 (0x1ea), region = 32 }
   0xa   : > { %p582_p7 = scmp.ne.s32.totalorder (!%p185_p3), %s670_s12, 0 }
   0xe   : > { %s798_s13 = smov (!%p226_p5, %s674_s13), 1 }
   0xf   : > { %s229_s19 = scalar_select %p228_p6, %s670_s12, 1 }
  0x10   : > { %s575_s20 = sshll.u32 %s798_s13, 1  ;;  %s581_s21 = sshll.u32 %s798_s13, 3 }
  0x11   : > { %s231_s22 = sadd.s32 %s575_s20, %s229_s19  ;;  %s745_s25 = scalar_lea.vmem %s786_s3, %s581_s21 }
  0x12   : > { %s576_s26 = sshll.u32 %s231_s22, 3  ;;  %257 = sbr.rel (%p582_p7) target bundleno = 26 (0x1a), region = 36 }
  0x13   : > { %s233_s29 = scalar_lea.vmem %s783_s0, %s576_s26  ;;  %s241_s5 = scalar_lea.vmem %s784_s1, %s576_s26 }
  0x14   : > { %s249_s8 = scalar_lea.vmem %s785_s2, %s576_s26 }
  0x17   : > { %v688_v0 = vmov 0.0  }
  0x18   : > { %258 = vst [vmem:[%s745_s25] sm:$0xff] %v688_v0  ;;  %259 = vst [vmem:[#allocation2] sm:$0x1] %v688_v0 }
  0x19   : > { %260 = vst [vmem:[#allocation3] sm:$0x1] %v688_v0  ;;  %261 = vst [vmem:[#allocation3 + $0x1] sm:$0x1] %v688_v0 }
  0x1a PF: > { %v262_v1 = vld [vmem:[%s233_s29] sm:$0xff]  ;;  %v689_v12 = vmov 0.0   ;;  %s690_s9 = smov 1   ;;  %s691_s10 = smov 127   ;;  %vm308_vm1 = vcmask 1040384   ;;  %vm296_vm2 = vcmask 1046528  }
  0x1b   : > { %v329_v2 = vld [vmem:[%s241_s5] sm:$0xff]  ;;  %v263_v4 = vmax.f32 %v262_v1, 0.0  ;;  %vm282_vm3 = vcmask 1039360  }
  0x1c   : > { %v394_v3 = vld [vmem:[%s249_s8] sm:$0xff]  ;;  %v330_v5 = vmax.f32 %v329_v2, 0.0 }
  0x1d   : > { %v395_v6 = vmax.f32 %v394_v3, 0.0  ;;  %v264_v7 = vmin.f32 %v263_v4, 10.0 }
  0x1e   : > { %v331_v8 = vmin.f32 %v330_v5, 10.0 }
  0x1f   : > { %v396_v9 = vmin.f32 %v395_v6, 10.0  ;;  %vm265_vm0 = vcmp.gt.f32.partialorder %v264_v7, 0.0001  ;;  %v268_v14 = vld [vmem:[#allocation2] sm:$0x1] }
  0x20   : > { %v332_v10 = vsub.f32 %v331_v8, %v264_v7  ;;  %v583_v13 = vsel %vm265_vm0, 1.0, %v689_v12  ;;  %v372_v15 = vld [vmem:[#allocation3] sm:$0x1]  ;;  %v438_v16 = vld [vmem:[#allocation3 + $0x1] sm:$0x1] }
  0x21   : > { %v397_v11 = vsub.f32 %v396_v9, %v264_v7  ;;  %460 = vst [vmem:[#allocation2 - $0x7] sm:$0x80] %v583_v13  ;;  %v274_v29 = vrot.slane %v583_v13, 7  ;;  %v277_v31 = vmul.f32 %v583_v13, %v268_v14 }
  0x22   : > { %334 = vrot.lane.b32.xlu0 %v332_v10, %s690_s9  ;;  %393 = vst [vmem:[#allocation3 - $0x7] sm:$0x80] %v332_v10  ;;  %v354_v27 = vrot.slane %v332_v10, 7  ;;  %v373_v28 = vsub.f32 %v332_v10, %v372_v15 }
  0x23   : > { %399 = vrot.lane.b32.xlu1 %v397_v11, %s690_s9  ;;  %459 = vst [vmem:[#allocation3 - $0x6] sm:$0x80] %v397_v11  ;;  %v276_v33 = vmul.f32 %v583_v13, %v274_v29  ;;  %v309_v35 = vsel %vm308_vm1, %v277_v31, 0.0  ;;  %v419_v43 = vrot.slane %v397_v11, 7  ;;  %v439_v46 = vsub.f32 %v397_v11, %v438_v16 }
  0x24   : > { %v356_v30 = vsub.f32 %v332_v10, %v354_v27  ;;  %v374_v32 = vand.u32 2147483647, %v373_v28 }
  0x25   : > { %v294_v37 = vrot.slane %v276_v33, 1  ;;  %v421_v44 = vsub.f32 %v397_v11, %v419_v43  ;;  %v440_v48 = vand.u32 2147483647, %v439_v46 }
  0x26   : > { %270 = vrot.lane.b32.xlu0 %v583_v13, %s690_s9  ;;  %v357_v34 = vand.u32 2147483647, %v356_v30  ;;  %v375_v36 = vmul.f32 %v374_v32, %v277_v31 }
  0x27   : > { %v297_v40 = vsel %vm296_vm2, %v294_v37, 0.0  ;;  %v422_v45 = vand.u32 2147483647, %v421_v44  ;;  %v441_v53 = vmul.f32 %v440_v48, %v277_v31 }
  0x28   : > { %v358_v38 = vmul.f32 %v357_v34, %v276_v33  ;;  %v376_v39 = vsel %vm308_vm1, %v375_v36, 0.0 }
  0x29   : > { %v423_v47 = vmul.f32 %v422_v45, %v276_v33  ;;  %v442_v58 = vsel %vm308_vm1, %v441_v53, 0.0 }
  0x2a   : > { %v360_v41 = vrot.slane %v358_v38, 1 }
  0x2b   : > { %v425_v52 = vrot.slane %v423_v47, 1 }
  0x2c   : > { %v362_v42 = vsel %vm296_vm2, %v360_v41, 0.0 }
  0x2d   : > { %v427_v57 = vsel %vm296_vm2, %v425_v52, 0.0 }
  0x94   : > { %v335_v17 = vpop.permute.xlu0 %334 }
  0x95   : > { %v400_v18 = vpop.permute.xlu1 %399  ;;  %v337_v19 = vsub.f32 %v332_v10, %v335_v17 }
  0x96   : > { %v402_v20 = vsub.f32 %v397_v11, %v400_v18 }
  0x97   : > { %v338_v22 = vand.u32 2147483647, %v337_v19 }
  0x98   : > { %v271_v21 = vpop.permute.xlu0 %270  ;;  %v403_v23 = vand.u32 2147483647, %v402_v20 }
  0x99   : > { %v273_v24 = vmul.f32 %v583_v13, %v271_v21 }
  0x9b   : > { %279 = vrot.lane.b32.xlu1 %v273_v24, %s691_s10  ;;  %v339_v25 = vmul.f32 %v338_v22, %v273_v24  ;;  %v404_v26 = vmul.f32 %v403_v23, %v273_v24 }
  0x9d   : > { %341 = vrot.lane.b32.xlu0 %v339_v25, %s691_s10 }
  0x9f   : > { %406 = vrot.lane.b32.xlu1 %v404_v26, %s691_s10 }
  0xbc   : > { %310 = vadd.xlane.f32.xlu0 %v309_v35 }
  0xc0   : > { %377 = vadd.xlane.f32.xlu0 %v376_v39 }
  0xc3   : > { %298 = vadd.xlane.f32.xlu1 %v297_v40 }
  0xc7   : > { %363 = vadd.xlane.f32.xlu1 %v362_v42 }
 0x10d   : > { %v280_v49 = vpop.permute.xlu1 %279 }
 0x10e   : > { %v283_v50 = vsel %vm282_vm3, %v280_v49, 0.0 }
 0x10f   : > { %v342_v51 = vpop.permute.xlu0 %341  ;;  %284 = vadd.xlane.f32.xlu0 %v283_v50 }
 0x110   : > { %v344_v55 = vsel %vm282_vm3, %v342_v51, 0.0 }
 0x111   : > { %v407_v54 = vpop.permute.xlu1 %406 }
 0x112   : > { %v409_v56 = vsel %vm282_vm3, %v407_v54, 0.0 }
 0x113   : > { %345 = vadd.xlane.f32.xlu0 %v344_v55  ;;  %410 = vadd.xlane.f32.xlu1 %v409_v56 }
 0x117   : > { %428 = vadd.xlane.f32.xlu0 %v427_v57  ;;  %443 = vadd.xlane.f32.xlu1 %v442_v58  ;;  %v320_v58 = vlaneseq }
 0x145   : > { %v311_v59 = vpop.xlane.xlu0 %310 }
 0x146   : > { %v312_v0 = vrot.slane %v311_v59, 4 }
 0x148   : > { %v313_v4 = vadd.f32 %v312_v0, %v311_v59  ;;  %v321_v59 = vand.u32 127, %v320_v58 }
 0x149   : > { %v378_v62 = vpop.xlane.xlu0 %377 }
 0x14a   : > { %v379_v1 = vrot.slane %v378_v62, 4  ;;  %v314_v10 = vrot.slane %v313_v4, 2  ;;  %vm388_vm4 = vcmp.eq.s32.totalorder %v321_v59, 1  ;;  %vm325_vm6 = vcmp.eq.s32.totalorder %v321_v59, 0 }
 0x14b   : > { %vm454_vm8 = vcmp.eq.s32.totalorder %v321_v59, 2 }
 0x14c   : > { %v299_v60 = vpop.xlane.xlu1 %298  ;;  %v380_v5 = vadd.f32 %v379_v1, %v378_v62  ;;  %v315_v20 = vadd.f32 %v314_v10, %v313_v4  ;;  %v461_v4 = vld [vmem:[%s745_s25] sm:$0xff] }
 0x14d   : > { %v300_v61 = vrot.slane %v299_v60, 4 }
 0x14e   : > { %v381_v12 = vrot.slane %v380_v5, 2  ;;  %v316_v34 = vrot.slane %v315_v20, 1 }
 0x14f   : > { %v301_v2 = vadd.f32 %v300_v61, %v299_v60  ;;  %v323_v60 = vshrl.u32 %v320_v58, 7 }
 0x150   : > { %v364_v63 = vpop.xlane.xlu1 %363  ;;  %v382_v28 = vadd.f32 %v381_v12, %v380_v5  ;;  %v317_v47 = vadd.f32 %v316_v34, %v315_v20 }
 0x151   : > { %v365_v3 = vrot.slane %v364_v63, 4  ;;  %v302_v6 = vrot.slane %v301_v2, 2  ;;  %vm324_vm5 = vcmp.eq.s32.totalorder %v323_v60, 0 }
 0x152   : > { %v383_v42 = vrot.slane %v382_v28, 1  ;;  %vm389_vm7 = vmand %vm324_vm5, %vm388_vm4 }
 0x153   : > { %v366_v7 = vadd.f32 %v365_v3, %v364_v63  ;;  %v303_v16 = vadd.f32 %v302_v6, %v301_v2  ;;  %vm326_vm9 = vmand %vm324_vm5, %vm325_vm6 }
 0x154   : > { %v384_v53 = vadd.f32 %v383_v42, %v382_v28  ;;  %vm455_vm10 = vmand %vm324_vm5, %vm454_vm8 }
 0x155   : > { %v367_v13 = vrot.slane %v366_v7, 2  ;;  %v304_v26 = vrot.slane %v303_v16, 1 }
 0x157   : > { %v368_v27 = vadd.f32 %v367_v13, %v366_v7  ;;  %v305_v40 = vadd.f32 %v304_v26, %v303_v16 }
 0x159   : > { %v369_v41 = vrot.slane %v368_v27, 1 }
 0x15b   : > { %v370_v51 = vadd.f32 %v369_v41, %v368_v27 }
 0x198   : > { %v285_v8 = vpop.xlane.xlu0 %284 }
 0x199   : > { %v286_v9 = vrot.slane %v285_v8, 4 }
 0x19b   : > { %v287_v11 = vadd.f32 %v286_v9, %v285_v8 }
 0x19c   : > { %v346_v14 = vpop.xlane.xlu0 %345  ;;  %v411_v15 = vpop.xlane.xlu1 %410 }
 0x19d   : > { %v288_v17 = vrot.slane %v287_v11, 2  ;;  %v347_v18 = vrot.slane %v346_v14, 4  ;;  %v412_v19 = vrot.slane %v411_v15, 4 }
 0x19f   : > { %v348_v21 = vadd.f32 %v347_v18, %v346_v14  ;;  %v413_v22 = vadd.f32 %v412_v19, %v411_v15  ;;  %v289_v23 = vadd.f32 %v288_v17, %v287_v11 }
 0x1a0   : > { %v429_v24 = vpop.xlane.xlu0 %428  ;;  %v444_v25 = vpop.xlane.xlu1 %443 }
 0x1a1   : > { %v349_v29 = vrot.slane %v348_v21, 2  ;;  %v414_v30 = vrot.slane %v413_v22, 2  ;;  %v430_v31 = vrot.slane %v429_v24, 4  ;;  %v445_v32 = vrot.slane %v444_v25, 4 }
 0x1a2   : > { %v290_v33 = vrot.slane %v289_v23, 1 }
 0x1a3   : > { %v431_v35 = vadd.f32 %v430_v31, %v429_v24  ;;  %v446_v36 = vadd.f32 %v445_v32, %v444_v25  ;;  %v350_v37 = vadd.f32 %v349_v29, %v348_v21  ;;  %v415_v38 = vadd.f32 %v414_v30, %v413_v22 }
 0x1a4   : > { %v291_v39 = vadd.f32 %v290_v33, %v289_v23 }
 0x1a5   : > { %v432_v43 = vrot.slane %v431_v35, 2  ;;  %v447_v44 = vrot.slane %v446_v36, 2  ;;  %v351_v45 = vrot.slane %v350_v37, 1  ;;  %v416_v46 = vrot.slane %v415_v38, 1 }
 0x1a6   : > { %586 = vpush %v291_v39 }
 0x1a7   : > { %v433_v48 = vadd.f32 %v432_v43, %v431_v35  ;;  %v448_v49 = vadd.f32 %v447_v44, %v446_v36  ;;  %588 = vpush %v305_v40  ;;  %v352_v50 = vadd.f32 %v351_v45, %v350_v37  ;;  %v417_v52 = vadd.f32 %v416_v46, %v415_v38 }
 0x1a8   : > { %590 = vpush %v317_v47 }
 0x1a9   : > { %592 = vpush %v352_v50  ;;  %v434_v54 = vrot.slane %v433_v48, 1  ;;  %v449_v55 = vrot.slane %v448_v49, 1 }
 0x1aa   : > { %594 = vpush %v370_v51 }
 0x1ab   : > { %596 = vpush %v384_v53  ;;  %v435_v56 = vadd.f32 %v434_v54, %v433_v48  ;;  %v450_v57 = vadd.f32 %v449_v55, %v448_v49 }
 0x1ac   : > { %598 = vpush %v417_v52 }
 0x1ad   : > { %600 = vpush %v435_v56 }
 0x1ae   : > { %602 = vpush %v450_v57 }
 0x1d7   : > { %s587_s11 = spop %586 }
 0x1d8   : > { %s589_s12 = spop %588 }
 0x1d9   : > { %s307_s13 = sadd.f32 %s589_s12, %s587_s11  ;;  %s591_s19 = spop %590 }
 0x1da   : > { %s593_s20 = spop %592 }
 0x1db   : > { %s319_s21 = sadd.f32 %s591_s19, %s307_s13  ;;  %s595_s22 = spop %594 }
 0x1dc   : > { %s386_s23 = sadd.f32 %s595_s22, %s593_s20  ;;  %s597_s24 = spop %596 }
 0x1dd   : > { %s599_s26 = spop %598  ;;  %v327_v61 = vstv %s319_s21 }
 0x1de   : > { %s387_s27 = sadd.f32 %s597_s24, %s386_s23  ;;  %s601_s28 = spop %600  ;;  %v328_v0 = vsel %vm326_vm9, %v327_v61, 0.0 }
 0x1df   : > { %s452_s29 = sadd.f32 %s601_s28, %s599_s26  ;;  %s603_s30 = spop %602 }
 0x1e0   : > { %v390_v62 = vstv %s387_s27 }
 0x1e1   : > { %v391_v63 = vsel %vm389_vm7, %v390_v62, 0.0  ;;  %s453_s4 = sadd.f32 %s603_s30, %s452_s29 }
 0x1e2   : > { %v392_v1 = vadd.f32 %v391_v63, %v328_v0 }
 0x1e3   : > { %v456_v2 = vstv %s453_s4 }
 0x1e4   : > { %v457_v3 = vsel %vm455_vm10, %v456_v2, 0.0 }
 0x1e5   : > { %v458_v5 = vadd.f32 %v457_v3, %v392_v1 }
 0x1e7   : > { %v462_v6 = vadd.f32 %v461_v4, %v458_v5 }
 0x1e9   : > { %463 = vst [vmem:[%s745_s25] sm:$0xff] %v462_v6 }
 0x1ea PF: > { %s13_s16 = sadd.s32 1, %s686_s16   ;;  %s787_s12 = smov %s678_s14 }
 0x1eb   : > { %p10_p8 = scmp.ge.s32.totalorder %s13_s16, 6   ;;  %s788_s13 = smov %s682_s15 }
 0x1ec   : > { %s789_s14 = smov %s792_s17  ;;  %s790_s15 = smov %s796_s18 }
 0x1ed   :  { %12 = sbr.rel (!%p10_p8) target bundleno = 3 (0x3), region = 73 }

</bundles_post_ra>
